<compile_context>
chip_gen: v5e
topology: v5e:2x2
jax: 0.10.0
libtpu: 0.0.40
codegen_flags: <defaults>
</compile_context>

<pallas_src>
import jax
import jax.numpy as jnp
from jax.experimental import pallas as pl
from jax.experimental.pallas import tpu as pltpu

_LANE = 128
_SUBLANE = 8
_WIDE_LANES = 1024                         # lane-dense slab width for big inputs
_TARGET_TILE_BYTES = 2 * 1024 * 1024       # ~2 MiB per ref per grid step
_VMEM_WORKING_BUDGET = 24 * 1024 * 1024    # (N+1) refs x 2 buffers must fit here
_VMEM_LIMIT_BYTES = 48 * 1024 * 1024       # safe on v5e/v6e (128 MiB) and v7x (64 MiB)


def _mean_kernel(*refs):
    """refs = (in_0, ..., in_{N-1}, out); every tile is (block_rows, width)."""
    in_refs, o_ref = refs[:-1], refs[-1]
    n = len(in_refs)
    out_dtype = o_ref.dtype
    # f32 stays f32; narrower dtypes accumulate in f32 then cast back on store.
    acc_dtype = out_dtype if out_dtype == jnp.float32 else jnp.float32

    acc = in_refs[0][...]
    if acc.dtype != acc_dtype:
        acc = acc.astype(acc_dtype)
    for r in in_refs[1:]:
        x = r[...]
        if x.dtype != acc_dtype:
            x = x.astype(acc_dtype)
        acc = acc + x

    res = acc * jnp.asarray(1.0 / n, dtype=acc_dtype)
    if res.dtype != out_dtype:
        res = res.astype(out_dtype)
    o_ref[...] = res


def _choose_tiling(total, n_inputs, itemsize):
    """Pick (lane_width, block_rows) for a lane-dense slab of `total` elements."""
    width = _WIDE_LANES if total >= _SUBLANE * _WIDE_LANES else _LANE
    # VMEM working set: (n_inputs + 1) refs x 2 pipeline buffers x tile_bytes.
    max_tile_bytes = max(_SUBLANE * width * itemsize,
                         _VMEM_WORKING_BUDGET // (2 * (n_inputs + 1)))
    tile_bytes = min(_TARGET_TILE_BYTES, max_tile_bytes)
    tile_elems = max(_SUBLANE * width, tile_bytes // itemsize)
    # Round down to a multiple of (8, width) so block_rows % 8 == 0.
    tile_elems = max(_SUBLANE * width,
                     (tile_elems // (_SUBLANE * width)) * (_SUBLANE * width))
    return width, tile_elems // width


@jax.jit
def mean_output(*branch_tensors):
    """Elementwise mean of N equal-shaped tensors (MeanOutput.forward)."""
    assert len(branch_tensors) >= 1
    x0 = branch_tensors[0]
    orig_shape = x0.shape
    out_dtype = x0.dtype
    n = len(branch_tensors)

    if n == 1:
        # mean over a single stacked branch is the branch itself.
        return x0

    itemsize = jnp.dtype(out_dtype).itemsize
    total = 1
    for d in orig_shape:
        total *= d

    width, block_rows = _choose_tiling(total, n, itemsize)

    row_align = _SUBLANE * width                       # pad granularity: 8 full rows
    padded = ((total + row_align - 1) // row_align) * row_align
    rows = padded // width                             # multiple of 8
    block_rows = min(block_rows, rows)                 # stays a multiple of 8

    def to_slab(x):
        flat = jnp.ravel(x)
        if padded != total:                            # skip the copy when aligned
            flat = jnp.pad(flat, (0, padded - total))
        return flat.reshape(rows, width)

    slabs = [to_slab(x) for x in branch_tensors]

    grid = (pl.cdiv(rows, block_rows),)
    spec = pl.BlockSpec((block_rows, width), lambda i: (i, 0))

    out = pl.pallas_call(
        _mean_kernel,
        out_shape=jax.ShapeDtypeStruct((rows, width), out_dtype),
        grid_spec=pltpu.PrefetchScalarGridSpec(
            num_scalar_prefetch=0,
            grid=grid,
            in_specs=[spec] * n,
            out_specs=spec,
        ),
        compiler_params=pltpu.CompilerParams(
            dimension_semantics=("parallel",),
            vmem_limit_bytes=_VMEM_LIMIT_BYTES,
        ),
    )(*slabs)

    flat_out = out.reshape(-1)
    if padded != total:
        flat_out = flat_out[:total]
    return flat_out.reshape(orig_shape)


def mean_output_from_dict(branch_tensors):
    """Mirror of MeanOutput.forward(dict[int, Tensor])."""
    return mean_output(*branch_tensors.values())


if __name__ == "__main__":
    key = jax.random.PRNGKey(0)

    # Case 1: typical NCHW activations, 3 branches (row-aligned path, no pad).
    num_branches = 3
    shape = (2, 4, 16, 16)
    keys = jax.random.split(key, num_branches)
    branches = [jax.random.normal(k, shape, dtype=jnp.float32) for k in keys]

    out = mean_output(*branches)
    out = jax.block_until_ready(out)
    ref = jnp.mean(jnp.stack(branches, axis=-1), axis=-1)
    assert out.shape == shape
    assert out.dtype == jnp.float32
    assert jnp.allclose(out, ref, atol=1e-6, rtol=1e-6)

    # Case 2: odd shape exercising the padded-tail path, 2 branches.
    shape2 = (2, 3, 7, 5)
    keys2 = jax.random.split(jax.random.PRNGKey(1), 2)
    branches2 = [jax.random.normal(k, shape2, dtype=jnp.float32) for k in keys2]
    out2 = jax.block_until_ready(mean_output(*branches2))
    ref2 = jnp.mean(jnp.stack(branches2, axis=-1), axis=-1)
    assert out2.shape == shape2
    assert jnp.allclose(out2, ref2, atol=1e-6, rtol=1e-6)

    # Case 3: bf16 branches (accumulate-in-f32 path).
    keys3 = jax.random.split(jax.random.PRNGKey(2), 4)
    branches3 = [jax.random.normal(k, shape, dtype=jnp.bfloat16) for k in keys3]
    out3 = jax.block_until_ready(mean_output(*branches3))
    ref3 = jnp.mean(jnp.stack([b.astype(jnp.float32) for b in branches3],
                              axis=-1), axis=-1).astype(jnp.bfloat16)
    assert out3.dtype == jnp.bfloat16
    assert jnp.allclose(out3.astype(jnp.float32), ref3.astype(jnp.float32),
                        atol=2e-2, rtol=2e-2)

    # Dict-style entry point matching the torch module signature.
    out4 = jax.block_until_ready(
        mean_output_from_dict({i: b for i, b in enumerate(branches)}))
    assert jnp.allclose(out4, ref, atol=1e-6, rtol=1e-6)

    print("KERNEL_OK")
</pallas_src>

<mosaic_0001>
module attributes {stable_mosaic.version = 11 : i64} {
  func.func @_mean_kernel(%arg0: i32, %arg1: memref<16x128xf32, #tpu.memory_space<vmem>>, %arg2: memref<16x128xf32, #tpu.memory_space<vmem>>, %arg3: memref<16x128xf32, #tpu.memory_space<vmem>>, %arg4: memref<16x128xf32, #tpu.memory_space<vmem>>) attributes {dimension_semantics = [#tpu.dimension_semantics<parallel>], iteration_bounds = array<i64: 1>, scalar_prefetch = 0 : i64, scratch_operands = 0 : i64, tpu.core_type = #tpu.core_type<tc>, window_params = [{transform_indices = @transform_0, window_bounds = array<i64: 16, 128>}, {transform_indices = @transform_1, window_bounds = array<i64: 16, 128>}, {transform_indices = @transform_2, window_bounds = array<i64: 16, 128>}, {transform_indices = @transform_3, window_bounds = array<i64: 16, 128>}]} {
    %c0 = arith.constant 0 : index
    %c0_0 = arith.constant 0 : index
    %0 = vector.load %arg1[%c0, %c0_0] : memref<16x128xf32, #tpu.memory_space<vmem>>, vector<16x128xf32>
    %c0_1 = arith.constant 0 : index
    %c0_2 = arith.constant 0 : index
    %1 = vector.load %arg2[%c0_1, %c0_2] : memref<16x128xf32, #tpu.memory_space<vmem>>, vector<16x128xf32>
    %2 = arith.addf %0, %1 : vector<16x128xf32>
    %c0_3 = arith.constant 0 : index
    %c0_4 = arith.constant 0 : index
    %3 = vector.load %arg3[%c0_3, %c0_4] : memref<16x128xf32, #tpu.memory_space<vmem>>, vector<16x128xf32>
    %4 = arith.addf %2, %3 : vector<16x128xf32>
    %cst = arith.constant 0.333333343 : f32
    %5 = vector.broadcast %cst : f32 to vector<16x128xf32>
    %6 = arith.mulf %4, %5 : vector<16x128xf32>
    %c0_5 = arith.constant 0 : index
    %c0_6 = arith.constant 0 : index
    %7 = vector.load %arg4[%c0_5, %c0_6] : memref<16x128xf32, #tpu.memory_space<vmem>>, vector<16x128xf32>
    tpu.vector_store %arg4[%c0_5, %c0_6], %6 {strides = array<i32>} : memref<16x128xf32, #tpu.memory_space<vmem>>, vector<16x128xf32>,
    return
  }
  func.func @transform_0(%arg0: i32) -> (i32, i32) {
    %c0_i32 = arith.constant 0 : i32
    %c0_i32_0 = arith.constant 0 : i32
    return %arg0, %c0_i32 : i32, i32
  }
  func.func @transform_1(%arg0: i32) -> (i32, i32) {
    %c0_i32 = arith.constant 0 : i32
    %c0_i32_0 = arith.constant 0 : i32
    return %arg0, %c0_i32 : i32, i32
  }
  func.func @transform_2(%arg0: i32) -> (i32, i32) {
    %c0_i32 = arith.constant 0 : i32
    %c0_i32_0 = arith.constant 0 : i32
    return %arg0, %c0_i32 : i32, i32
  }
  func.func @transform_3(%arg0: i32) -> (i32, i32) {
    %c0_i32 = arith.constant 0 : i32
    %c0_i32_0 = arith.constant 0 : i32
    return %arg0, %c0_i32 : i32, i32
  }
}

</mosaic_0001>

<bundles_post_ra>
// kernel: mean_output.1
= control target key start
LH: loop header
LB: loop body
LE: loop exit
PB: predicated region body
PF: predicated region fallthrough
CT: control target
= control target key end

     0   :  { %s76_s0 = inlined_call_operand.vmem [shape: f32[16,128], index: 0, kind: input, shape index: {}]   ;;  %s77_s1 = inlined_call_operand.vmem [shape: f32[16,128], index: 1, kind: input, shape index: {}]   ;;  %s78_s2 = inlined_call_operand.vmem [shape: f32[16,128], index: 2, kind: input, shape index: {}]   ;;  %s79_s3 = inlined_call_operand.vmem [shape: f32[16,128], index: 3, kind: output, shape index: {}]  }
   0x1   :  { %v14_v0 = vld [vmem:[%s76_s0] sm:$0xff]  ;;  %v15_v4 = vld [vmem:[%s76_s0 + $0x8] sm:$0xff] }
   0x2   :  { %v16_v1 = vld [vmem:[%s77_s1] sm:$0xff]  ;;  %v17_v5 = vld [vmem:[%s77_s1 + $0x8] sm:$0xff] }
   0x3   :  { %v20_v2 = vld [vmem:[%s78_s2] sm:$0xff]  ;;  %v18_v3 = vadd.f32 %v16_v1, %v14_v0  ;;  %v21_v6 = vld [vmem:[%s78_s2 + $0x8] sm:$0xff]  ;;  %v19_v7 = vadd.f32 %v17_v5, %v15_v4 }
   0x5   :  { %v22_v8 = vadd.f32 %v20_v2, %v18_v3  ;;  %v23_v9 = vadd.f32 %v21_v6, %v19_v7 }
   0x7   :  { %v24_v10 = vmul.f32 0.33333334, %v22_v8  ;;  %v25_v11 = vmul.f32 0.33333334, %v23_v9 }
   0x9   :  { %26 = vst [vmem:[%s79_s3] sm:$0xff] %v24_v10 }
   0xa   :  { %27 = vst [vmem:[%s79_s3 + $0x8] sm:$0xff] %v25_v11 }

</bundles_post_ra>
